<compile_context>
chip_gen: v7x
topology: tpu7x:2x2x1
jax: 0.10.0
libtpu: 0.0.40
codegen_flags: <defaults>
</compile_context>

<pallas_src>
import functools

import jax
import jax.numpy as jnp
from jax.experimental import pallas as pl
from jax.experimental.pallas import tpu as pltpu

# Conservative tiling budget that fits every generation (v7x has only 64 MiB
# physical VMEM / 32 MiB default scoped limit; v5e/v6e have 128 MiB physical).
_VMEM_BUDGET_BYTES = 40 * 1024 * 1024
_VMEM_LIMIT_BYTES = 48 * 1024 * 1024


def _round_up(x, m):
    return (x + m - 1) // m * m


# --------------------------------------------------------------------------- #
# Kernels
# --------------------------------------------------------------------------- #
def _linear_kernel_direct(x_ref, w_ref, b_ref, o_ref):
    # Whole K in one block: no accumulator scratch, no init/finalize branches.
    acc = jnp.dot(x_ref[...], w_ref[...], preferred_element_type=jnp.float32)
    o_ref[...] = (acc + b_ref[...].astype(jnp.float32)).astype(o_ref.dtype)


def _linear_kernel_reduce(x_ref, w_ref, b_ref, o_ref, acc_ref):
    # K is the innermost ("arbitrary") reduction grid axis; f32 VMEM accumulator.
    k = pl.program_id(2)

    @pl.when(k == 0)
    def _():
        acc_ref[...] = jnp.zeros_like(acc_ref)

    acc_ref[...] += jnp.dot(
        x_ref[...], w_ref[...], preferred_element_type=jnp.float32
    )

    @pl.when(k == pl.num_programs(2) - 1)
    def _():
        # Bias added exactly once, in f32, in the finalize step.
        o_ref[...] = (acc_ref[...] + b_ref[...].astype(jnp.float32)).astype(o_ref.dtype)


# --------------------------------------------------------------------------- #
# Tiling heuristics
# --------------------------------------------------------------------------- #
def _choose_tiling(M, K, N, in_isz, out_isz, budget):
    """Pick (bm, bn, bk). bk <= K; the wrapper zero-pads K to a multiple of bk."""
    # 512 is a multiple of 16 (bf16 sublane packing).  NOTE(v7x): for M <= 512
    # and bn == N this yields a single grid point, which runs on one TensorCore;
    # acceptable for the tiny classifier shapes this module targets.
    bm = M if M <= 512 else 512

    def footprint(bn, bk, with_acc):
        f = 2 * bm * bk * in_isz          # x tile, double-buffered
        f += 2 * bk * bn * in_isz         # W_t tile, double-buffered
        f += 2 * bn * 4                   # bias tile (f32), double-buffered
        f += 2 * bm * bn * out_isz        # output tile, double-buffered
        if with_acc:
            f += bm * bn * 4              # f32 accumulator scratch
        return f

    # 1) No-reduction fast path: whole K and whole N in one block per M tile.
    #    Covers the real LinearClassifier shapes (in_dim=32, fc2_dim=64: W_t=8KiB).
    if footprint(N, K, with_acc=False) <= budget:
        return bm, N, K

    # 2) bn: full N if it fits next to a 256-deep K tile (x streams exactly once,
    #    lane-dense stores), else the largest multiple of 256, then of 128.
    bn = None
    if footprint(N, 256, with_acc=True) <= budget:
        bn = N
    else:
        cands = list(range((N // 256) * 256, 0, -256)) + \
                list(range((N // 128) * 128, 0, -128))
        for c in cands:
            if footprint(c, 256, with_acc=True) <= budget:
                bn = c
                break
        if bn is None:
            bn = 128

    # 3) bk: largest multiple of 128 (capped at 2048) that fits the budget;
    #    prefer an exact divisor of K (skips the zero-padding copy) if it is not
    #    much smaller than the budget-optimal choice.
    bk = min(K, 128)
    cap128 = (min(2048, K) // 128) * 128
    for c in range(cap128, 127, -128):
        if footprint(bn, c, with_acc=True) <= budget:
            bk = c
            break
    for c in range(bk, max(bk // 2, 127), -128):
        if K % c == 0:
            bk = c
            break
    return bm, bn, bk


# --------------------------------------------------------------------------- #
# Wrapper
# --------------------------------------------------------------------------- #
@functools.partial(
    jax.jit, static_argnames=("block_m", "block_n", "block_k", "use_bf16")
)
def linear_classifier_forward(
    x, w_t, b, *, block_m=None, block_n=None, block_k=None, use_bf16=True
):
    """y = x @ w_t + b   (equivalent to PyTorch fc1(x) with w_t = weight.T)."""
    M, K = x.shape
    Kw, N = w_t.shape
    assert K == Kw, "x feature dim must match weight input dim"
    out_dtype = x.dtype

    # Feed the MXU bf16 (full-rate on all generations, half the HBM bytes);
    # accumulate and add the bias in f32, return the original dtype.
    compute_dtype = jnp.bfloat16 if (use_bf16 and x.dtype == jnp.float32) else x.dtype
    in_isz = jnp.dtype(compute_dtype).itemsize
    out_isz = jnp.dtype(out_dtype).itemsize

    abm, abn, abk = _choose_tiling(M, K, N, in_isz, out_isz, _VMEM_BUDGET_BYTES)
    bm = min(block_m if block_m is not None else abm, M)
    bn = min(block_n if block_n is not None else abn, N)
    bk = min(block_k if block_k is not None else abk, K)

    # (8,128) block rule (16 sublanes for packed bf16), full-dim blocks allowed.
    sub = 16 if in_isz == 2 else 8
    assert bm == M or bm % sub == 0, f"block_m must be a multiple of {sub} or equal M"
    assert bn == N or bn % 128 == 0, "block_n must be a multiple of 128 or equal N"
    assert bk == K or bk % 128 == 0, "block_k must be a multiple of 128 or equal K"

    # Ragged K: zero-pad (correct for the reduction) rather than an unbounded
    # full-K fallback block that could blow v7x's 64 MiB VMEM.
    k_pad = 0 if bk == K else _round_up(K, bk) - K
    Kp = K + k_pad

    xc = x.astype(compute_dtype)
    wc = w_t.astype(compute_dtype)
    if k_pad:
        xc = jnp.pad(xc, ((0, 0), (0, k_pad)))
        wc = jnp.pad(wc, ((0, k_pad), (0, 0)))
    b2 = b.reshape(1, N)

    nm, nn, nk = pl.cdiv(M, bm), pl.cdiv(N, bn), pl.cdiv(Kp, bk)

    # Real streaming traffic: x re-read once per N tile, W_t once per M tile.
    cost = pl.CostEstimate(
        flops=2 * M * N * K,
        transcendentals=0,
        bytes_accessed=int(
            M * Kp * in_isz * nn
            + Kp * N * in_isz * nm
            + N * jnp.dtype(b.dtype).itemsize
            + M * N * out_isz
        ),
    )
    out_shape = jax.ShapeDtypeStruct((M, N), out_dtype)

    if nk == 1 and nn == 1:
        # Fast path (the actual LinearClassifier shape): grid over M only,
        # full W_t + bias resident, no scratch, no reduction branches.
        # TODO(synk): for N < 128 (e.g. fc2_dim=64) stores are masked vst.msk;
        # padding N or fusing into the consumer would avoid that.
        return pl.pallas_call(
            _linear_kernel_direct,
            out_shape=out_shape,
            grid_spec=pltpu.PrefetchScalarGridSpec(
                num_scalar_prefetch=0,
                grid=(nm,),
                in_specs=[
                    pl.BlockSpec((bm, Kp), lambda i: (i, 0)),
                    pl.BlockSpec((Kp, N), lambda i: (0, 0)),
                    pl.BlockSpec((1, N), lambda i: (0, 0)),
                ],
                out_specs=pl.BlockSpec((bm, N), lambda i: (i, 0)),
            ),
            compiler_params=pltpu.CompilerParams(
                dimension_semantics=("parallel",),
                vmem_limit_bytes=_VMEM_LIMIT_BYTES,
            ),
            cost_estimate=cost,
        )(xc, wc, b2)

    if nk == 1:
        # Single K step but tiled N: still no accumulator scratch needed.
        return pl.pallas_call(
            _linear_kernel_direct,
            out_shape=out_shape,
            grid_spec=pltpu.PrefetchScalarGridSpec(
                num_scalar_prefetch=0,
                grid=(nm, nn),
                in_specs=[
                    pl.BlockSpec((bm, Kp), lambda i, j: (i, 0)),
                    pl.BlockSpec((Kp, bn), lambda i, j: (0, j)),
                    pl.BlockSpec((1, bn), lambda i, j: (0, j)),
                ],
                out_specs=pl.BlockSpec((bm, bn), lambda i, j: (i, j)),
            ),
            compiler_params=pltpu.CompilerParams(
                dimension_semantics=("parallel", "parallel"),
                vmem_limit_bytes=_VMEM_LIMIT_BYTES,
            ),
            cost_estimate=cost,
        )(xc, wc, b2)

    # General 3-D path: (M tiles, N tiles, K tiles) with f32 accumulator scratch.
    return pl.pallas_call(
        _linear_kernel_reduce,
        out_shape=out_shape,
        grid_spec=pltpu.PrefetchScalarGridSpec(
            num_scalar_prefetch=0,
            grid=(nm, nn, nk),
            in_specs=[
                pl.BlockSpec((bm, bk), lambda i, j, k: (i, k)),   # x tile
                pl.BlockSpec((bk, bn), lambda i, j, k: (k, j)),   # W_t tile
                pl.BlockSpec((1, bn), lambda i, j, k: (0, j)),    # bias tile
            ],
            out_specs=pl.BlockSpec((bm, bn), lambda i, j, k: (i, j)),
            scratch_shapes=[pltpu.VMEM((bm, bn), jnp.float32)],
        ),
        compiler_params=pltpu.CompilerParams(
            dimension_semantics=("parallel", "parallel", "arbitrary"),
            vmem_limit_bytes=_VMEM_LIMIT_BYTES,
        ),
        cost_estimate=cost,
    )(xc, wc, b2)


def init_linear_params(key, in_dim, out_dim, dtype=jnp.float32):
    """Deterministic init matching nn.Linear default: U(-1/sqrt(in), 1/sqrt(in))."""
    kw, kb = jax.random.split(key)
    bound = 1.0 / jnp.sqrt(jnp.asarray(in_dim, dtype))
    # PyTorch stores weight as (out_dim, in_dim); we keep the transposed form.
    weight = jax.random.uniform(kw, (out_dim, in_dim), dtype, -bound, bound)
    bias = jax.random.uniform(kb, (out_dim,), dtype, -bound, bound)
    return weight.T, bias  # (in_dim, out_dim), (out_dim,)


if __name__ == "__main__":
    key = jax.random.PRNGKey(0)
    k_x, k_p, k_x2, k_p2 = jax.random.split(key, 4)

    # --- Small shape consistent with the module (opt.in_dim=32, opt.fc2_dim=64).
    # Takes the M-only fast path (no reduction axis, no scratch).
    batch, in_dim, fc2_dim = 8, 32, 64
    x = jax.random.normal(k_x, (batch, in_dim), jnp.float32)
    w_t, bias = init_linear_params(k_p, in_dim, fc2_dim)

    y = jax.block_until_ready(linear_classifier_forward(x, w_t, bias))
    y_ref = x @ w_t + bias[None, :]
    assert y.shape == (batch, fc2_dim)
    assert jnp.allclose(y, y_ref, atol=2e-2, rtol=2e-2), "small-shape mismatch"

    # --- Medium shape forcing the 3-D reduction path (explicit tile overrides)
    # and the zero-padded ragged-K handling (K=500 is not a multiple of 128).
    M2, K2, N2 = 256, 500, 384
    x2 = jax.random.normal(k_x2, (M2, K2), jnp.float32)
    w_t2, b2 = init_linear_params(k_p2, K2, N2)

    y2 = jax.block_until_ready(
        linear_classifier_forward(
            x2, w_t2, b2, block_m=128, block_n=256, block_k=128
        )
    )
    y2_ref = jnp.dot(x2, w_t2) + b2[None, :]
    assert y2.shape == (M2, N2)
    assert jnp.allclose(y2, y2_ref, atol=5e-2, rtol=5e-2), "reduction-path mismatch"

    print("KERNEL_OK")
</pallas_src>

<mosaic_0001>
module attributes {stable_mosaic.version = 11 : i64} {
  func.func @_linear_kernel_direct(%arg0: i32, %arg1: memref<8x32xbf16, #tpu.memory_space<vmem>>, %arg2: memref<32x64xbf16, #tpu.memory_space<vmem>>, %arg3: memref<1x64xf32, #tpu.memory_space<vmem>>, %arg4: memref<8x64xf32, #tpu.memory_space<vmem>>) attributes {dimension_semantics = [#tpu.dimension_semantics<parallel>], iteration_bounds = array<i64: 1>, scalar_prefetch = 0 : i64, scratch_operands = 0 : i64, tpu.core_type = #tpu.core_type<tc>, window_params = [{transform_indices = @transform_0, window_bounds = array<i64: 8, 32>}, {pipeline_mode = #tpu.pipeline_mode<synchronous>, transform_indices = @transform_1, window_bounds = array<i64: 32, 64>}, {pipeline_mode = #tpu.pipeline_mode<synchronous>, transform_indices = @transform_2, window_bounds = array<i64: 1, 64>}, {transform_indices = @transform_3, window_bounds = array<i64: 8, 64>}]} {
    %c0 = arith.constant 0 : index
    %c0_0 = arith.constant 0 : index
    %0 = vector.load %arg1[%c0, %c0_0] : memref<8x32xbf16, #tpu.memory_space<vmem>>, vector<8x32xbf16>
    %c0_1 = arith.constant 0 : index
    %c0_2 = arith.constant 0 : index
    %1 = vector.load %arg2[%c0_1, %c0_2] : memref<32x64xbf16, #tpu.memory_space<vmem>>, vector<32x64xbf16>
    %cst = arith.constant dense<0.000000e+00> : vector<8x64xf32>
    %2 = tpu.matmul %0, %1, %cst {dimension_numbers = #tpu.dot_dimension_numbers<[1], [0], [0], [1], [0, 0, 1, 1], [], []>} : vector<8x32xbf16>, vector<32x64xbf16>, vector<8x64xf32> -> vector<8x64xf32>
    %c0_3 = arith.constant 0 : index
    %c0_4 = arith.constant 0 : index
    %3 = vector.load %arg3[%c0_3, %c0_4] : memref<1x64xf32, #tpu.memory_space<vmem>>, vector<1x64xf32>
    %4 = vector.broadcast %3 : vector<1x64xf32> to vector<8x64xf32>
    %5 = arith.addf %2, %4 : vector<8x64xf32>
    %c0_5 = arith.constant 0 : index
    %c0_6 = arith.constant 0 : index
    %6 = vector.load %arg4[%c0_5, %c0_6] : memref<8x64xf32, #tpu.memory_space<vmem>>, vector<8x64xf32>
    tpu.vector_store %arg4[%c0_5, %c0_6], %5 {strides = array<i32>} : memref<8x64xf32, #tpu.memory_space<vmem>>, vector<8x64xf32>,
    return
  }
  func.func @transform_0(%arg0: i32) -> (i32, i32) {
    %c0_i32 = arith.constant 0 : i32
    %c0_i32_0 = arith.constant 0 : i32
    return %arg0, %c0_i32 : i32, i32
  }
  func.func @transform_1(%arg0: i32) -> (i32, i32) {
    %c0_i32 = arith.constant 0 : i32
    %c0_i32_0 = arith.constant 0 : i32
    %c0_i32_1 = arith.constant 0 : i32
    return %c0_i32, %c0_i32_0 : i32, i32
  }
  func.func @transform_2(%arg0: i32) -> (i32, i32) {
    %c0_i32 = arith.constant 0 : i32
    %c0_i32_0 = arith.constant 0 : i32
    %c0_i32_1 = arith.constant 0 : i32
    return %c0_i32, %c0_i32_0 : i32, i32
  }
  func.func @transform_3(%arg0: i32) -> (i32, i32) {
    %c0_i32 = arith.constant 0 : i32
    %c0_i32_0 = arith.constant 0 : i32
    return %arg0, %c0_i32 : i32, i32
  }
}

</mosaic_0001>

<bundles_post_ra>
// kernel: linear_classifier_forward.1
= control target key start
LH: loop header
LB: loop body
LE: loop exit
PB: predicated region body
PF: predicated region fallthrough
CT: control target
= control target key end

     0   :  { %v144_v1 = vmov 0.0   ;;  %vm145_vm0 = vmmov 0   ;;  %s191_s0 = inlined_call_operand.vmem [shape: bf16[8,32], index: 0, kind: input, shape index: {}]   ;;  %s192_s1 = inlined_call_operand.vmem [shape: bf16[32,64], index: 1, kind: input, shape index: {}]   ;;  %s193_s2 = inlined_call_operand.vmem [shape: f32[1,64], index: 2, kind: input, shape index: {}]   ;;  %s194_s3 = inlined_call_operand.hbm [shape: f32[8,64], index: 3, kind: output, shape index: {}]  }
   0x1   :  { %v118_v0 = vld [vmem:[%s192_s1] sm:$0xff]   ;;  %107 = vmatprep.subr.bf16.mxu0 %v144_v1  ;;  %v119_v2 = vld [vmem:[%s192_s1 + $0x8] sm:$0xff]   ;;  %111 = vmatprep.mubr.msk.bf16.mxu0 %vm145_vm0, %v144_v1 }
   0x2   :  { %108 = vmatpush3.bf16.msra.mxu0 %v118_v0 }
   0x3   :  { %109 = vmatprep.subr.bf16.mxu0 %v144_v1 }
   0x4   :  { %8 = vsyncpa [#allocation3], 0  ;;  %v16_v3 = vld [vmem:[%s191_s0] sm:$0xf]  ;;  %vm40_vm1 = vcmask 261120   ;;  %s146_s20 = smov [#allocation2]  }
   0x5   :  { %v100_v4 = vld [vmem:[%s193_s2] ss:$0 sm:$0xff]  ;;  %s92_s21 = sshll.u32 %s146_s20, 4  ;;  %vm84_vm2 = vcmask 523264   ;;  %s93_s21 = int_to_ptr.vmem [resolvable:$true] %s92_s21 }
   0x6   :  { %110 = vmatpush3.bf16.msra.mxu0 %v119_v2  ;;  %s120_s1 = scalar_lea.vmem %s93_s21, 128  ;;  %p125_p1 = scmp.lt.s32.totalorder %s93_s21, %s93_s21 }
   0x7   :  { %p121_p0 = scmp.ne.s32.totalorder %s93_s21, %s120_s1  ;;  %p126_p2 = scmp.lt.s32.totalorder %s120_s1, %s120_s1 }
   0x9   :  { %112 = vmatmul.mubr.msk.bf16.vlgmr.msra.gmra.mrb[0].mxu0 %vm40_vm1, %v16_v3  ;;  %p127_p3 = por %p126_p2, %p125_p1 }
   0xb   :  { %p128_p4 = pnand %p127_p3, %p121_p0 }
  0xdc   :  { %v78_v5 = vpop.f32.mrb[0].mxu0 }
  0xdd   :  { %v79_v6 = vadd.f32 %v100_v4, %v78_v5  ;;  %v113_v7 = vpop.f32.mrb[1].mxu0 }
  0xde   :  { %v81_v8 = vpop.f32.mrb[2].mxu0 }
  0xdf   :  { %v114_v9 = vpop.f32.mrb[3].mxu0  ;;  %85 = vst.msk [vmem:[#allocation2] sm:$0xff] %vm84_vm2, %v79_v6 }
  0xe0   :  { %131 = shalt.err (!%p128_p4)
}
  0xe1   :  { %s132_s2 = scalar_lea.hbm %s194_s3, 128 }
  0xe2   :  { %p133_p5 = scmp.ne.s32.totalorder %s194_s3, %s132_s2  ;;  %p136_p6 = scmp.lt.u32.totalorder %s132_s2, %s194_s3 }
  0xe4   :  { %p138_p7 = pnand %p136_p6, %p133_p5 }
  0xe6   :  { %141 = shalt.err (!%p138_p7)
}
  0xe7   :  { %95 = dma.vmem_to_hbm [thread:$0]  %s93_s21, 128, %s194_s3, [#allocation3]  }
  0xe8   :  { %142 = dma.done.wait [#allocation3], 128  }
  0xe9   :  { %143 = vsyncadd [#allocation3], 4294967168 }
  0xea   :  { %99 = vsyncpa [#allocation3], 1 }

</bundles_post_ra>
